<compile_context>
chip_gen: v6e
topology: v6e:2x2x1
jax: 0.10.0
libtpu: 0.0.40
codegen_flags: <defaults>
</compile_context>

<pallas_src>
import functools

import jax
import jax.numpy as jnp
from jax.experimental import pallas as pl
from jax.experimental.pallas import tpu as pltpu

_MIB = 1024 * 1024


def _sublane_multiple(dtype) -> int:
    """Native sublane tile for the dtype (f32: 8, bf16: 16, int8/fp8: 32)."""
    return {4: 8, 2: 16, 1: 32}.get(jnp.dtype(dtype).itemsize, 8)


def _round_up(v: int, m: int) -> int:
    return ((v + m - 1) // m) * m


# ----------------------------------------------------------------------------
# Single-pass kernel: all of N resident in the block, reduce over axis 0.
# Works for both (N, tile_r, 128) and (N, tile_f) blocks.
# ----------------------------------------------------------------------------
def _norm_kernel(x_ref, o_ref):
    x = x_ref[...].astype(jnp.float32)
    ms = jnp.mean(x * x, axis=0, keepdims=True)     # per-feature mean(x^2)
    inv = jax.lax.rsqrt(2.0 * ms)                   # EUP rsqrt (free slot)
    # Re-read x for the scale so the upcast copy need not stay live across
    # the whole reduction (keeps VMEM pressure at the budgeted level).
    o_ref[...] = (x_ref[...].astype(jnp.float32) * inv).astype(o_ref.dtype)


# ----------------------------------------------------------------------------
# Two-phase (large batch) kernels: N-tiled accumulation, then broadcast scale.
# ----------------------------------------------------------------------------
def _sumsq_inv_kernel(x_ref, inv_ref, acc_ref, *, n_total, tile_n):
    j = pl.program_id(1)            # N-tile index (last grid axis, "arbitrary")

    @pl.when(j == 0)
    def _init():
        acc_ref[...] = jnp.zeros_like(acc_ref)

    x = x_ref[...].astype(jnp.float32)              # (tile_n, tile_r, 128)
    ids = j * tile_n + jax.lax.broadcasted_iota(jnp.int32, x.shape, 0)
    x = jnp.where(ids < n_total, x, 0.0)            # mask N-boundary block
    acc_ref[...] += jnp.sum(x * x, axis=0)

    @pl.when(j == pl.num_programs(1) - 1)
    def _finalize():
        inv_ref[...] = jax.lax.rsqrt(2.0 * acc_ref[...] / n_total)


def _scale_kernel(x_ref, inv_ref, o_ref):
    o_ref[...] = (x_ref[...].astype(jnp.float32) * inv_ref[...]).astype(o_ref.dtype)


def _norm_two_phase(x3d, orig_shape, vmem_budget_bytes):
    n, rows, _ = x3d.shape
    dtype = x3d.dtype
    itemsize = jnp.dtype(dtype).itemsize
    sm = _sublane_multiple(dtype)
    rows_pad = _round_up(rows, sm)

    tile_r = min(rows_pad, 4 * sm)
    # Bytes per unit of tile_n: in/out double-buffered + f32 intermediates.
    per_n = tile_r * 128 * (4 * itemsize + 2 * 4)
    tile_n = max(8, (vmem_budget_bytes // per_n) // 8 * 8)
    tile_n = min(tile_n, _round_up(n, 8))

    n_tiles_f = pl.cdiv(rows, tile_r)
    n_tiles_n = pl.cdiv(n, tile_n)

    est = tile_n * per_n + 3 * tile_r * 128 * 4
    limit = int(min(48 * _MIB, max(2 * est, 16 * _MIB)))

    inv = pl.pallas_call(
        functools.partial(_sumsq_inv_kernel, n_total=n, tile_n=tile_n),
        out_shape=jax.ShapeDtypeStruct((rows, 128), jnp.float32),
        grid=(n_tiles_f, n_tiles_n),
        in_specs=[pl.BlockSpec((tile_n, tile_r, 128), lambda i, j: (j, i, 0))],
        out_specs=pl.BlockSpec((tile_r, 128), lambda i, j: (i, 0)),
        scratch_shapes=[pltpu.VMEM((tile_r, 128), jnp.float32)],
        compiler_params=pltpu.CompilerParams(
            dimension_semantics=("parallel", "arbitrary"),
            vmem_limit_bytes=limit),
    )(x3d)

    out = pl.pallas_call(
        _scale_kernel,
        out_shape=jax.ShapeDtypeStruct(x3d.shape, dtype),
        grid=(n_tiles_n, n_tiles_f),
        in_specs=[pl.BlockSpec((tile_n, tile_r, 128), lambda i, j: (i, j, 0)),
                  pl.BlockSpec((tile_r, 128), lambda i, j: (j, 0))],
        out_specs=pl.BlockSpec((tile_n, tile_r, 128), lambda i, j: (i, j, 0)),
        compiler_params=pltpu.CompilerParams(
            dimension_semantics=("parallel", "parallel"),
            vmem_limit_bytes=limit),
    )(x3d, inv)
    return out.reshape(orig_shape)


# ----------------------------------------------------------------------------
# Wrapper
# ----------------------------------------------------------------------------
def norm_layer(x: jax.Array, vmem_budget_bytes: int = 32 * _MIB) -> jax.Array:
    """out = x / sqrt(2 * mean(x^2, axis=0)); x is (N, ...) e.g. NCHW."""
    orig_shape = x.shape
    n = orig_shape[0]
    f = 1
    for d in orig_shape[1:]:
        f *= d
    dtype = x.dtype
    itemsize = jnp.dtype(dtype).itemsize
    sm = _sublane_multiple(dtype)

    # Advisory: one read + one write of x; square, reduce-add, scale; rsqrt per feature.
    cost = pl.CostEstimate(flops=3 * n * f, transcendentals=f,
                           bytes_accessed=2 * n * f * itemsize)

    def _params(est_bytes):
        # Scoped VMEM derived from actual block bytes, capped at 48 MiB so it
        # stays safe on v7x (64 MiB/TC); well above v5e's 16 MiB default.
        limit = int(min(48 * _MIB, max(2 * est_bytes, 16 * _MIB)))
        return pltpu.CompilerParams(dimension_semantics=("parallel",),
                                    vmem_limit_bytes=limit)

    if f % 128 == 0:
        # Lane-dense 3-D layout: (N, rows, 128); tile the sublane (rows) axis.
        rows = f // 128
        rows_pad = _round_up(rows, sm)
        x3d = x.reshape(n, rows, 128)
        # Bytes per unit of tile_r: in + out double-buffered (input dtype) plus
        # ~2 f32 block-sized intermediates inside the kernel body.
        per_row = n * 128 * (4 * itemsize + 2 * 4)

        if n * sm * 128 * (4 * itemsize + 2 * 4) > vmem_budget_bytes:
            # Batch too large to keep resident per block -> two-phase variant.
            return _norm_two_phase(x3d, orig_shape, vmem_budget_bytes)

        tile_r = max(sm, (vmem_budget_bytes // per_row) // sm * sm)
        tile_r = min(tile_r, rows_pad)
        # Keep >= 2 grid steps when possible: the "parallel" axis is sharded
        # across v7x's 2 TensorCores; near-zero cost on single-core chips.
        if rows_pad >= 2 * sm:
            tile_r = min(tile_r, _round_up(rows_pad // 2, sm))

        est = tile_r * per_row
        spec = pl.BlockSpec((n, tile_r, 128), lambda i: (0, i, 0))
        out = pl.pallas_call(
            _norm_kernel,
            out_shape=jax.ShapeDtypeStruct((n, rows, 128), dtype),
            grid=(pl.cdiv(rows, tile_r),),
            in_specs=[spec],
            out_specs=spec,
            compiler_params=_params(est),
            cost_estimate=cost,
        )(x3d)
        return out.reshape(orig_shape)

    # Fallback: F not a multiple of 128 -> 2-D (N, F) layout, lane-tiled.
    # VMEM rounds the sublane dim up, so budget with the padded batch size.
    x2d = x.reshape(n, f)
    n_pad = _round_up(n, sm)
    f_pad = _round_up(f, 128)
    per_lane_blk = n_pad * 128 * (4 * itemsize + 2 * 4)     # per 128 lanes
    units = max(1, vmem_budget_bytes // per_lane_blk)
    tile_f = min(units * 128, f_pad)
    if f_pad >= 256:                                        # v7x: >= 2 grid steps
        tile_f = min(tile_f, _round_up(f_pad // 2, 128))
    # TODO(synk): if even an (n, 128) block exceeds the budget (huge batch with
    # a non-128-multiple feature count), this path would also need the
    # two-phase accumulator treatment.
    est = (tile_f // 128) * per_lane_blk
    spec = pl.BlockSpec((n, tile_f), lambda i: (0, i))
    out = pl.pallas_call(
        _norm_kernel,
        out_shape=jax.ShapeDtypeStruct((n, f), dtype),
        grid=(pl.cdiv(f, tile_f),),
        in_specs=[spec],
        out_specs=spec,
        compiler_params=_params(est),
        cost_estimate=cost,
    )(x2d)
    return out.reshape(orig_shape)


def _reference(x):
    norm = jnp.sqrt(2.0 * jnp.mean(jnp.square(x), axis=0))
    return x / norm


if __name__ == "__main__":
    key = jax.random.PRNGKey(0)
    # NCHW, small shapes (batch=2, channels=4, spatial=16)
    x = jax.random.normal(key, (2, 4, 16, 16), dtype=jnp.float32)

    out = norm_layer(x)
    out = jax.block_until_ready(out)

    ref = _reference(x)
    assert out.shape == x.shape
    assert jnp.allclose(out, ref, atol=1e-5, rtol=1e-4), "mismatch vs reference"

    print("KERNEL_OK")
</pallas_src>

<mosaic_0001>
module attributes {stable_mosaic.version = 11 : i64} {
  func.func @_norm_kernel(%arg0: i32, %arg1: memref<2x8x128xf32, #tpu.memory_space<vmem>>, %arg2: memref<2x8x128xf32, #tpu.memory_space<vmem>>) attributes {dimension_semantics = [#tpu.dimension_semantics<parallel>], iteration_bounds = array<i64: 1>, scalar_prefetch = 0 : i64, scratch_operands = 0 : i64, tpu.core_type = #tpu.core_type<tc>, window_params = [{transform_indices = @transform_0, window_bounds = array<i64: 2, 8, 128>}, {transform_indices = @transform_1, window_bounds = array<i64: 2, 8, 128>}]} {
    %c0 = arith.constant 0 : index
    %c0_0 = arith.constant 0 : index
    %c0_1 = arith.constant 0 : index
    %0 = vector.load %arg1[%c0, %c0_0, %c0_1] : memref<2x8x128xf32, #tpu.memory_space<vmem>>, vector<2x8x128xf32>
    %1 = arith.mulf %0, %0 : vector<2x8x128xf32>
    %cst = arith.constant dense<0.000000e+00> : vector<8x128xf32>
    %2 = vector.multi_reduction <add>, %1, %cst [0] : vector<2x8x128xf32> to vector<8x128xf32>
    %3 = vector.shape_cast %2 : vector<8x128xf32> to vector<1x8x128xf32>
    %cst_2 = arith.constant 2.000000e+00 : f32
    %4 = vector.broadcast %cst_2 : f32 to vector<1x8x128xf32>
    %5 = arith.divf %3, %4 : vector<1x8x128xf32>
    %cst_3 = arith.constant 2.000000e+00 : f32
    %6 = vector.broadcast %cst_3 : f32 to vector<1x8x128xf32>
    %7 = arith.mulf %6, %5 : vector<1x8x128xf32>
    %8 = math.rsqrt %7 : vector<1x8x128xf32>
    %c0_4 = arith.constant 0 : index
    %c0_5 = arith.constant 0 : index
    %c0_6 = arith.constant 0 : index
    %9 = vector.load %arg1[%c0_4, %c0_5, %c0_6] : memref<2x8x128xf32, #tpu.memory_space<vmem>>, vector<2x8x128xf32>
    %10 = vector.broadcast %8 : vector<1x8x128xf32> to vector<2x8x128xf32>
    %11 = arith.mulf %9, %10 : vector<2x8x128xf32>
    %c0_7 = arith.constant 0 : index
    %c0_8 = arith.constant 0 : index
    %c0_9 = arith.constant 0 : index
    %12 = vector.load %arg2[%c0_7, %c0_8, %c0_9] : memref<2x8x128xf32, #tpu.memory_space<vmem>>, vector<2x8x128xf32>
    tpu.vector_store %arg2[%c0_7, %c0_8, %c0_9], %11 {strides = array<i32>} : memref<2x8x128xf32, #tpu.memory_space<vmem>>, vector<2x8x128xf32>,
    return
  }
  func.func @transform_0(%arg0: i32) -> (i32, i32, i32) {
    %c0_i32 = arith.constant 0 : i32
    %c0_i32_0 = arith.constant 0 : i32
    %c0_i32_1 = arith.constant 0 : i32
    return %c0_i32, %arg0, %c0_i32_0 : i32, i32, i32
  }
  func.func @transform_1(%arg0: i32) -> (i32, i32, i32) {
    %c0_i32 = arith.constant 0 : i32
    %c0_i32_0 = arith.constant 0 : i32
    %c0_i32_1 = arith.constant 0 : i32
    return %c0_i32, %arg0, %c0_i32_0 : i32, i32, i32
  }
}

</mosaic_0001>

<bundles_post_ra>
// kernel: tpu_custom_call.1
= control target key start
LH: loop header
LB: loop body
LE: loop exit
PB: predicated region body
PF: predicated region fallthrough
CT: control target
= control target key end

     0   :  { %6 = vsyncpa [#allocation3], 0  ;;  %s129_s0 = inlined_call_operand.hbm [shape: f32[2,8,128], index: 0, kind: input, shape index: {}]   ;;  %s130_s1 = inlined_call_operand.hbm [shape: f32[2,8,128], index: 1, kind: output, shape index: {}]  }
   0x1   :  { %7 = vsyncpa [#allocation4], 0  ;;  %s103_s6 = smov [#allocation2]  }
   0x2   :  { %s13_s7 = sshll.u32 %s103_s6, 4  ;;  %s14_s7 = int_to_ptr.vmem [resolvable:$true] %s13_s7 }
   0x3   :  { %s67_s8 = scalar_lea.vmem %s14_s7, 256  ;;  %p72_p1 = scmp.lt.s32.totalorder %s14_s7, %s14_s7 }
   0x4   :  { %p68_p0 = scmp.ne.s32.totalorder %s14_s7, %s67_s8  ;;  %p73_p2 = scmp.lt.s32.totalorder %s67_s8, %s67_s8 }
   0x6   :  { %p74_p3 = por %p73_p2, %p72_p1 }
   0x8   :  { %p75_p4 = pnand %p74_p3, %p68_p0 }
   0xa   :  { %78 = shalt.err (!%p75_p4)
}
   0xb   :  { %s104_s9 = smov 128   ;;  %s105_s10 = smov 8  }
   0xc   :  { %19 = dma.hbm_to_vmem [thread:$0]  %s129_s0, 256, %s14_s7, [#allocation3], %s104_s9, %s104_s9, %s105_s10  }
   0xd   :  { %99 = dma.done.wait [#allocation3], 256  }
   0xe   :  { %100 = vsyncadd [#allocation3], 4294967040  ;;  %v23_v0 = vld [vmem:[#allocation2] sm:$0xff]  ;;  %v24_v1 = vld [vmem:[#allocation2 + $0x8] sm:$0xff]  ;;  %s106_s13 = smov [#allocation5]  }
   0xf   :  { %v25_v2 = vmul.f32 %v23_v0, %v23_v0  ;;  %v26_v3 = vmul.f32 %v24_v1, %v24_v1  ;;  %s41_s14 = sshll.u32 %s106_s13, 4  ;;  %s42_s14 = int_to_ptr.vmem [resolvable:$true] %s41_s14 }
  0x10   :  { %s79_s15 = scalar_lea.vmem %s42_s14, 256  ;;  %p84_p6 = scmp.lt.s32.totalorder %s42_s14, %s42_s14 }
  0x11   :  { %v27_v4 = vadd.f32 %v26_v3, %v25_v2  ;;  %p80_p5 = scmp.ne.s32.totalorder %s42_s14, %s79_s15  ;;  %p85_p7 = scmp.lt.s32.totalorder %s79_s15, %s79_s15 }
  0x13   :  { %v29_v5 = vmul.f32 0.5, %v27_v4  ;;  %p86_p8 = por %p85_p7, %p84_p6 }
  0x15   :  { %v30_v6 = vmul.f32 2.0, %v29_v5  ;;  %p87_p9 = pnand %p86_p8, %p80_p5 }
  0x17   :  { %57 = vrsqrt.f32 %v30_v6 }
  0x24   :  { %v58_v7 = vpop.eup %57 }
  0x25   :  { %v32_v8 = vmul.f32 %v58_v7, %v23_v0  ;;  %v33_v9 = vmul.f32 %v58_v7, %v24_v1 }
  0x27   :  { %34 = vst [vmem:[#allocation5] sm:$0xff] %v32_v8  ;;  %35 = vst [vmem:[#allocation5 + $0x8] sm:$0xff] %v33_v9 }
  0x28   :  { %90 = shalt.err (!%p87_p9)
}
  0x29   :  { %47 = dma.vmem_to_hbm [thread:$0]  %s42_s14, 256, %s130_s1, [#allocation4], %s104_s9, %s104_s9, %s105_s10  }
  0x2a   :  { %101 = dma.done.wait [#allocation4], 256  }
  0x2b   :  { %102 = vsyncadd [#allocation4], 4294967040 }
  0x2c   :  { %51 = vsyncpa [#allocation3], 1 }
  0x2d   :  { %52 = vsyncpa [#allocation4], 1 }

</bundles_post_ra>
